<compile_context>
chip_gen: v7x
topology: tpu7x:2x2x1
jax: 0.10.0
libtpu: 0.0.40
codegen_flags: <defaults>
</compile_context>

<pallas_src>
import jax
import jax.numpy as jnp
from jax.experimental import pallas as pl
from jax.experimental.pallas import tpu as pltpu


HIDDEN = 256


def qnet_kernel(s_ref, a_ref, w1s_ref, w1a_ref, b1_ref,
                w2_ref, b2_ref, w3_ref, b3_ref, o_ref):
    # Layer 1 (split concat): h1 = relu(state @ W1_s + action @ W1_a + b1)
    h1 = jnp.dot(s_ref[...], w1s_ref[...], preferred_element_type=jnp.float32)
    h1 = h1 + jnp.dot(a_ref[...], w1a_ref[...],
                      preferred_element_type=jnp.float32)
    h1 = jnp.maximum(h1 + b1_ref[...], 0.0)

    # Layer 2: (TB, 256) @ (256, 256) + b2 -> ReLU
    h2 = jnp.dot(h1, w2_ref[...], preferred_element_type=jnp.float32)
    h2 = jnp.maximum(h2 + b2_ref[...], 0.0)

    # Layer 3: 256 -> 1 as VPU multiply + lane reduction (w3 is a (1,256) row)
    # instead of a degenerate (256, 1) MXU matmul.
    q = jnp.sum(h2 * w3_ref[...], axis=-1, keepdims=True) + b3_ref[...]
    o_ref[...] = q


def _round_up(x, m):
    return ((x + m - 1) // m) * m


def qnet_forward(state, action, params, *, block_b=256):
    """Pallas forward pass of Qnet: q = l3(relu(l2(relu(l1([state, action])))))."""
    w1s, w1a, b1, w2, b2, w3, b3 = params
    B, inputsize = state.shape
    actionsize = action.shape[1]
    d_in = inputsize + actionsize

    # Batch tile: large batches use block_b-row tiles (multiple of 256 keeps the
    # v6e/v7x 256-wide MXU full); tiny batches are padded to one >=8-row tile.
    if B >= block_b:
        tb = block_b
    else:
        tb = _round_up(max(B, 8), 8)
    b_pad = _round_up(B, tb)
    if b_pad != B:
        state = jnp.pad(state, ((0, b_pad - B), (0, 0)))
        action = jnp.pad(action, ((0, b_pad - B), (0, 0)))

    grid = (b_pad // tb,)
    row = lambda i: (i, 0)      # activation tiles move with the grid step
    fixed = lambda i: (0, 0)    # weights/biases stay VMEM-resident

    flops = 2 * b_pad * (d_in * HIDDEN + HIDDEN * HIDDEN + HIDDEN)
    bytes_accessed = 4 * (
        b_pad * (inputsize + actionsize + 1)           # state + action + q out
        + d_in * HIDDEN + HIDDEN * HIDDEN              # W1, W2
        + 2 * HIDDEN + HIDDEN + 1                      # b1, b2, w3, b3
    )

    out = pl.pallas_call(
        qnet_kernel,
        out_shape=jax.ShapeDtypeStruct((b_pad, 1), jnp.float32),
        grid=grid,
        in_specs=[
            pl.BlockSpec((tb, inputsize), row),
            pl.BlockSpec((tb, actionsize), row),
            pl.BlockSpec((inputsize, HIDDEN), fixed),
            pl.BlockSpec((actionsize, HIDDEN), fixed),
            pl.BlockSpec((1, HIDDEN), fixed),
            pl.BlockSpec((HIDDEN, HIDDEN), fixed),
            pl.BlockSpec((1, HIDDEN), fixed),
            pl.BlockSpec((1, HIDDEN), fixed),
            pl.BlockSpec((1, 1), fixed),
        ],
        out_specs=pl.BlockSpec((tb, 1), row),
        compiler_params=pltpu.CompilerParams(
            dimension_semantics=("parallel",)),
        cost_estimate=pl.CostEstimate(
            flops=flops, transcendentals=0, bytes_accessed=bytes_accessed),
    )(state, action, w1s, w1a, b1, w2, b2, w3, b3)

    return out[:B]


def init_qnet_params(key, inputsize, actionsize):
    """Deterministic init mirroring nn.Linear defaults + the l3 override."""
    d_in = inputsize + actionsize
    k = jax.random.split(key, 7)

    def uniform(key, shape, bound):
        return jax.random.uniform(
            key, shape, dtype=jnp.float32, minval=-bound, maxval=bound
        )

    # l1: Linear(d_in, 256) -- PyTorch default U(-1/sqrt(fan_in), 1/sqrt(fan_in)),
    # split into state / action halves (concat-free layer 1).
    bound1 = 1.0 / jnp.sqrt(jnp.float32(d_in))
    w1s = uniform(k[0], (inputsize, HIDDEN), bound1)
    w1a = uniform(k[1], (actionsize, HIDDEN), bound1)
    b1 = uniform(k[2], (1, HIDDEN), bound1)
    # l2: Linear(256, 256)
    bound2 = 1.0 / jnp.sqrt(jnp.float32(HIDDEN))
    w2 = uniform(k[3], (HIDDEN, HIDDEN), bound2)
    b2 = uniform(k[4], (1, HIDDEN), bound2)
    # l3: Linear(256, 1) with explicit U(-0.003, 0.003) override; stored as a
    # (1, 256) row for the in-kernel mul+reduce.
    w3 = uniform(k[5], (1, HIDDEN), 0.003)
    b3 = uniform(k[6], (1, 1), 0.003)
    return (w1s, w1a, b1, w2, b2, w3, b3)


def qnet_reference(state, action, params):
    """Plain-JAX reference for correctness check."""
    w1s, w1a, b1, w2, b2, w3, b3 = params
    x = jnp.concatenate([state, action], axis=1)
    w1 = jnp.concatenate([w1s, w1a], axis=0)
    h1 = jnp.maximum(x @ w1 + b1, 0.0)
    h2 = jnp.maximum(h1 @ w2 + b2, 0.0)
    return h2 @ w3.T + b3


if __name__ == "__main__":
    key = jax.random.PRNGKey(0)
    k_param, k_state, k_action = jax.random.split(key, 3)

    batch = 2
    inputsize = 16   # e.g. observation dim
    actionsize = 8   # e.g. action dim

    params = init_qnet_params(k_param, inputsize, actionsize)
    state = jax.random.normal(k_state, (batch, inputsize), dtype=jnp.float32)
    action = jax.random.normal(k_action, (batch, actionsize), dtype=jnp.float32)

    q = qnet_forward(state, action, params)
    q = jax.block_until_ready(q)

    q_ref = qnet_reference(state, action, params)
    assert q.shape == (batch, 1), q.shape
    assert jnp.allclose(q, q_ref, atol=1e-5, rtol=1e-4), (q, q_ref)

    print("KERNEL_OK")
</pallas_src>

<mosaic_0001>
module attributes {stable_mosaic.version = 11 : i64} {
  func.func @qnet_kernel(%arg0: i32, %arg1: memref<8x16xf32, #tpu.memory_space<vmem>>, %arg2: memref<8x8xf32, #tpu.memory_space<vmem>>, %arg3: memref<16x256xf32, #tpu.memory_space<vmem>>, %arg4: memref<8x256xf32, #tpu.memory_space<vmem>>, %arg5: memref<1x256xf32, #tpu.memory_space<vmem>>, %arg6: memref<256x256xf32, #tpu.memory_space<vmem>>, %arg7: memref<1x256xf32, #tpu.memory_space<vmem>>, %arg8: memref<1x256xf32, #tpu.memory_space<vmem>>, %arg9: memref<1x1xf32, #tpu.memory_space<vmem>>, %arg10: memref<8x1xf32, #tpu.memory_space<vmem>>) attributes {dimension_semantics = [#tpu.dimension_semantics<parallel>], iteration_bounds = array<i64: 1>, scalar_prefetch = 0 : i64, scratch_operands = 0 : i64, tpu.core_type = #tpu.core_type<tc>, window_params = [{transform_indices = @transform_0, window_bounds = array<i64: 8, 16>}, {transform_indices = @transform_1, window_bounds = array<i64: 8, 8>}, {pipeline_mode = #tpu.pipeline_mode<synchronous>, transform_indices = @transform_2, window_bounds = array<i64: 16, 256>}, {pipeline_mode = #tpu.pipeline_mode<synchronous>, transform_indices = @transform_3, window_bounds = array<i64: 8, 256>}, {pipeline_mode = #tpu.pipeline_mode<synchronous>, transform_indices = @transform_4, window_bounds = array<i64: 1, 256>}, {pipeline_mode = #tpu.pipeline_mode<synchronous>, transform_indices = @transform_5, window_bounds = array<i64: 256, 256>}, {pipeline_mode = #tpu.pipeline_mode<synchronous>, transform_indices = @transform_6, window_bounds = array<i64: 1, 256>}, {pipeline_mode = #tpu.pipeline_mode<synchronous>, transform_indices = @transform_7, window_bounds = array<i64: 1, 256>}, {pipeline_mode = #tpu.pipeline_mode<synchronous>, transform_indices = @transform_8, window_bounds = array<i64: 1, 1>}, {transform_indices = @transform_9, window_bounds = array<i64: 8, 1>}]} {
    %c0 = arith.constant 0 : index
    %c0_0 = arith.constant 0 : index
    %0 = vector.load %arg1[%c0, %c0_0] : memref<8x16xf32, #tpu.memory_space<vmem>>, vector<8x16xf32>
    %c0_1 = arith.constant 0 : index
    %c0_2 = arith.constant 0 : index
    %1 = vector.load %arg3[%c0_1, %c0_2] : memref<16x256xf32, #tpu.memory_space<vmem>>, vector<16x256xf32>
    %cst = arith.constant dense<0.000000e+00> : vector<8x256xf32>
    %2 = tpu.matmul %0, %1, %cst {dimension_numbers = #tpu.dot_dimension_numbers<[1], [0], [0], [1], [0, 0, 1, 1], [], []>} : vector<8x16xf32>, vector<16x256xf32>, vector<8x256xf32> -> vector<8x256xf32>
    %c0_3 = arith.constant 0 : index
    %c0_4 = arith.constant 0 : index
    %3 = vector.load %arg2[%c0_3, %c0_4] : memref<8x8xf32, #tpu.memory_space<vmem>>, vector<8x8xf32>
    %c0_5 = arith.constant 0 : index
    %c0_6 = arith.constant 0 : index
    %4 = vector.load %arg4[%c0_5, %c0_6] : memref<8x256xf32, #tpu.memory_space<vmem>>, vector<8x256xf32>
    %cst_7 = arith.constant dense<0.000000e+00> : vector<8x256xf32>
    %5 = tpu.matmul %3, %4, %cst_7 {dimension_numbers = #tpu.dot_dimension_numbers<[1], [0], [0], [1], [0, 0, 1, 1], [], []>} : vector<8x8xf32>, vector<8x256xf32>, vector<8x256xf32> -> vector<8x256xf32>
    %6 = arith.addf %2, %5 : vector<8x256xf32>
    %c0_8 = arith.constant 0 : index
    %c0_9 = arith.constant 0 : index
    %7 = vector.load %arg5[%c0_8, %c0_9] : memref<1x256xf32, #tpu.memory_space<vmem>>, vector<1x256xf32>
    %8 = vector.broadcast %7 : vector<1x256xf32> to vector<8x256xf32>
    %9 = arith.addf %6, %8 : vector<8x256xf32>
    %cst_10 = arith.constant 0.000000e+00 : f32
    %10 = vector.broadcast %cst_10 : f32 to vector<8x256xf32>
    %11 = arith.maximumf %9, %10 : vector<8x256xf32>
    %c0_11 = arith.constant 0 : index
    %c0_12 = arith.constant 0 : index
    %12 = vector.load %arg6[%c0_11, %c0_12] : memref<256x256xf32, #tpu.memory_space<vmem>>, vector<256x256xf32>
    %cst_13 = arith.constant dense<0.000000e+00> : vector<8x256xf32>
    %13 = tpu.matmul %11, %12, %cst_13 {dimension_numbers = #tpu.dot_dimension_numbers<[1], [0], [0], [1], [0, 0, 1, 1], [], []>} : vector<8x256xf32>, vector<256x256xf32>, vector<8x256xf32> -> vector<8x256xf32>
    %c0_14 = arith.constant 0 : index
    %c0_15 = arith.constant 0 : index
    %14 = vector.load %arg7[%c0_14, %c0_15] : memref<1x256xf32, #tpu.memory_space<vmem>>, vector<1x256xf32>
    %15 = vector.broadcast %14 : vector<1x256xf32> to vector<8x256xf32>
    %16 = arith.addf %13, %15 : vector<8x256xf32>
    %cst_16 = arith.constant 0.000000e+00 : f32
    %17 = vector.broadcast %cst_16 : f32 to vector<8x256xf32>
    %18 = arith.maximumf %16, %17 : vector<8x256xf32>
    %c0_17 = arith.constant 0 : index
    %c0_18 = arith.constant 0 : index
    %19 = vector.load %arg8[%c0_17, %c0_18] : memref<1x256xf32, #tpu.memory_space<vmem>>, vector<1x256xf32>
    %20 = vector.broadcast %19 : vector<1x256xf32> to vector<8x256xf32>
    %21 = arith.mulf %18, %20 : vector<8x256xf32>
    %cst_19 = arith.constant dense<0.000000e+00> : vector<8xf32>
    %22 = vector.multi_reduction <add>, %21, %cst_19 [1] : vector<8x256xf32> to vector<8xf32>
    %23 = vector.shape_cast %22 : vector<8xf32> to vector<8x1xf32>
    %c0_20 = arith.constant 0 : index
    %c0_21 = arith.constant 0 : index
    %24 = vector.load %arg9[%c0_20, %c0_21] : memref<1x1xf32, #tpu.memory_space<vmem>>, vector<1x1xf32>
    %25 = vector.broadcast %24 : vector<1x1xf32> to vector<8x1xf32>
    %26 = arith.addf %23, %25 : vector<8x1xf32>
    %c0_22 = arith.constant 0 : index
    %c0_23 = arith.constant 0 : index
    %27 = vector.load %arg10[%c0_22, %c0_23] : memref<8x1xf32, #tpu.memory_space<vmem>>, vector<8x1xf32>
    tpu.vector_store %arg10[%c0_22, %c0_23], %26 {strides = array<i32>} : memref<8x1xf32, #tpu.memory_space<vmem>>, vector<8x1xf32>,
    return
  }
  func.func @transform_0(%arg0: i32) -> (i32, i32) {
    %c0_i32 = arith.constant 0 : i32
    %c0_i32_0 = arith.constant 0 : i32
    return %arg0, %c0_i32 : i32, i32
  }
  func.func @transform_1(%arg0: i32) -> (i32, i32) {
    %c0_i32 = arith.constant 0 : i32
    %c0_i32_0 = arith.constant 0 : i32
    return %arg0, %c0_i32 : i32, i32
  }
  func.func @transform_2(%arg0: i32) -> (i32, i32) {
    %c0_i32 = arith.constant 0 : i32
    %c0_i32_0 = arith.constant 0 : i32
    %c0_i32_1 = arith.constant 0 : i32
    return %c0_i32, %c0_i32_0 : i32, i32
  }
  func.func @transform_3(%arg0: i32) -> (i32, i32) {
    %c0_i32 = arith.constant 0 : i32
    %c0_i32_0 = arith.constant 0 : i32
    %c0_i32_1 = arith.constant 0 : i32
    return %c0_i32, %c0_i32_0 : i32, i32
  }
  func.func @transform_4(%arg0: i32) -> (i32, i32) {
    %c0_i32 = arith.constant 0 : i32
    %c0_i32_0 = arith.constant 0 : i32
    %c0_i32_1 = arith.constant 0 : i32
    return %c0_i32, %c0_i32_0 : i32, i32
  }
  func.func @transform_5(%arg0: i32) -> (i32, i32) {
    %c0_i32 = arith.constant 0 : i32
    %c0_i32_0 = arith.constant 0 : i32
    %c0_i32_1 = arith.constant 0 : i32
    return %c0_i32, %c0_i32_0 : i32, i32
  }
  func.func @transform_6(%arg0: i32) -> (i32, i32) {
    %c0_i32 = arith.constant 0 : i32
    %c0_i32_0 = arith.constant 0 : i32
    %c0_i32_1 = arith.constant 0 : i32
    return %c0_i32, %c0_i32_0 : i32, i32
  }
  func.func @transform_7(%arg0: i32) -> (i32, i32) {
    %c0_i32 = arith.constant 0 : i32
    %c0_i32_0 = arith.constant 0 : i32
    %c0_i32_1 = arith.constant 0 : i32
    return %c0_i32, %c0_i32_0 : i32, i32
  }
  func.func @transform_8(%arg0: i32) -> (i32, i32) {
    %c0_i32 = arith.constant 0 : i32
    %c0_i32_0 = arith.constant 0 : i32
    %c0_i32_1 = arith.constant 0 : i32
    return %c0_i32, %c0_i32_0 : i32, i32
  }
  func.func @transform_9(%arg0: i32) -> (i32, i32) {
    %c0_i32 = arith.constant 0 : i32
    %c0_i32_0 = arith.constant 0 : i32
    return %arg0, %c0_i32 : i32, i32
  }
}

</mosaic_0001>

<bundles_post_ra>
// kernel: tpu_custom_call.1
= control target key start
LH: loop header
LB: loop body
LE: loop exit
PB: predicated region body
PF: predicated region fallthrough
CT: control target
= control target key end

     0   :  { %s790_s0 = inlined_call_operand.hbm [shape: f32[8,16], index: 0, kind: input, shape index: {}]   ;;  %s791_s1 = inlined_call_operand.hbm [shape: f32[8,8], index: 1, kind: input, shape index: {}]   ;;  %s792_s2 = inlined_call_operand.hbm [shape: f32[16,256], index: 2, kind: input, shape index: {}]   ;;  %s793_s3 = inlined_call_operand.hbm [shape: f32[8,256], index: 3, kind: input, shape index: {}]   ;;  %s794_s4 = inlined_call_operand.vmem [shape: f32[1,256], index: 4, kind: input, shape index: {}]   ;;  %s795_s5 = inlined_call_operand.hbm [shape: f32[256,256], index: 5, kind: input, shape index: {}]   ;;  %s796_s6 = inlined_call_operand.vmem [shape: f32[1,256], index: 6, kind: input, shape index: {}]   ;;  %s797_s7 = inlined_call_operand.vmem [shape: f32[1,256], index: 7, kind: input, shape index: {}]   ;;  %s798_s8 = inlined_call_operand.<no memory space> [shape: f32[1,1], index: 8, kind: input, shape index: {}]   ;;  %s799_s9 = inlined_call_operand.vmem [shape: f32[8,1], index: 9, kind: output, shape index: {}]  }
   0x1   :  { %v14_v0 = vstv %s798_s8 }
   0x2   :  { %15 = vst [vmem:[#allocation2] sm:$0x1] %v14_v0 }
   0x3   :  { %16 = vsyncpa [#allocation4], 0 }
   0x4   :  { %17 = vsyncpa [#allocation6], 0 }
   0x5   :  { %18 = vsyncpa [#allocation9], 0  ;;  %s650_s11 = smov [#allocation5]   ;;  %s651_s13 = smov [#allocation8]  }
   0x6   :  { %s35_s12 = sshll.u32 %s650_s11, 4  ;;  %s57_s14 = sshll.u32 %s651_s13, 4  ;;  %s36_s12 = int_to_ptr.vmem [resolvable:$true] %s35_s12  ;;  %s58_s14 = int_to_ptr.vmem [resolvable:$true] %s57_s14 }
   0x7   :  { %s534_s17 = scalar_lea.hbm %s791_s1, 128 }
   0x8   :  { %p535_p0 = scmp.ne.s32.totalorder %s791_s1, %s534_s17  ;;  %p538_p1 = scmp.lt.u32.totalorder %s534_s17, %s791_s1 }
   0xa   :  { %p540_p2 = pnand %p538_p1, %p535_p0 }
   0xc   :  { %543 = shalt.err (!%p540_p2)
}
   0xd   :  { %s544_s21 = scalar_lea.vmem %s36_s12, 128  ;;  %p549_p4 = scmp.lt.s32.totalorder %s36_s12, %s36_s12 }
   0xe   :  { %p545_p3 = scmp.ne.s32.totalorder %s36_s12, %s544_s21  ;;  %p550_p5 = scmp.lt.s32.totalorder %s544_s21, %s544_s21 }
  0x10   :  { %p551_p6 = por %p550_p5, %p549_p4 }
  0x12   :  { %p552_p7 = pnand %p551_p6, %p545_p3 }
  0x14   :  { %555 = shalt.err (!%p552_p7)
}
  0x15   :  { %38 = dma.hbm_to_vmem [thread:$0]  %s791_s1, 128, %s36_s12, [#allocation6]  }
  0x16   :  { %s556_s26 = scalar_lea.hbm %s793_s3, 256 }
  0x17   :  { %p557_p8 = scmp.ne.s32.totalorder %s793_s3, %s556_s26  ;;  %p560_p9 = scmp.lt.u32.totalorder %s556_s26, %s793_s3 }
  0x19   :  { %p562_p10 = pnand %p560_p9, %p557_p8 }
  0x1b   :  { %565 = shalt.err (!%p562_p10)
}
  0x1c   :  { %s566_s10 = scalar_lea.vmem %s58_s14, 256  ;;  %p571_p12 = scmp.lt.s32.totalorder %s58_s14, %s58_s14 }
  0x1d   :  { %p567_p11 = scmp.ne.s32.totalorder %s58_s14, %s566_s10  ;;  %p572_p13 = scmp.lt.s32.totalorder %s566_s10, %s566_s10 }
  0x1f   :  { %p573_p0 = por %p572_p13, %p571_p12 }
  0x21   :  { %p574_p1 = pnand %p573_p0, %p567_p11 }
  0x23   :  { %577 = shalt.err (!%p574_p1)
}
  0x24   :  { %60 = dma.hbm_to_vmem [thread:$0]  %s793_s3, 256, %s58_s14, [#allocation9]  }
  0x25   :  { %s652_s12 = smov [#allocation3]   ;;  %s653_s15 = smov [#allocation7]  }
  0x26   :  { %s25_s13 = sshll.u32 %s652_s12, 4  ;;  %s44_s16 = sshll.u32 %s653_s15, 4  ;;  %s26_s13 = int_to_ptr.vmem [resolvable:$true] %s25_s13  ;;  %s735_s16 = int_to_ptr.vmem [resolvable:$true] %s44_s16 }
  0x27   :  { %s578_s19 = scalar_lea.hbm %s790_s0, 128 }
  0x28   :  { %p579_p2 = scmp.ne.s32.totalorder %s790_s0, %s578_s19  ;;  %p582_p3 = scmp.lt.u32.totalorder %s578_s19, %s790_s0 }
  0x2a   :  { %p584_p4 = pnand %p582_p3, %p579_p2 }
  0x2c   :  { %587 = shalt.err (!%p584_p4)
}
  0x2d   :  { %s588_s3 = scalar_lea.vmem %s26_s13, 128  ;;  %p593_p6 = scmp.lt.s32.totalorder %s26_s13, %s26_s13 }
  0x2e   :  { %p589_p5 = scmp.ne.s32.totalorder %s26_s13, %s588_s3  ;;  %p594_p7 = scmp.lt.s32.totalorder %s588_s3, %s588_s3 }
  0x30   :  { %p595_p8 = por %p594_p7, %p593_p6 }
  0x32   :  { %p596_p9 = pnand %p595_p8, %p589_p5 }
  0x34   :  { %599 = shalt.err (!%p596_p9)
}
  0x35   :  { %28 = dma.hbm_to_vmem [thread:$0]  %s790_s0, 128, %s26_s13, [#allocation4]  }
  0x36   :  { %s600_s26 = scalar_lea.hbm %s792_s2, 512 }
  0x37   :  { %p601_p10 = scmp.ne.s32.totalorder %s792_s2, %s600_s26  ;;  %p604_p11 = scmp.lt.u32.totalorder %s600_s26, %s792_s2 }
  0x39   :  { %p606_p12 = pnand %p604_p11, %p601_p10 }
  0x3b   :  { %609 = shalt.err (!%p606_p12)
}
  0x3c   :  { %s610_s10 = scalar_lea.vmem %s735_s16, 512  ;;  %p615_p0 = scmp.lt.s32.totalorder %s735_s16, %s735_s16 }
  0x3d   :  { %p611_p13 = scmp.ne.s32.totalorder %s735_s16, %s610_s10  ;;  %p616_p1 = scmp.lt.s32.totalorder %s610_s10, %s610_s10 }
  0x3f   :  { %p617_p2 = por %p616_p1, %p615_p0 }
  0x41   :  { %p618_p3 = pnand %p617_p2, %p611_p13 }
  0x43   :  { %621 = shalt.err (!%p618_p3)
}
  0x44   :  { %s654_s0 = smov 256   ;;  %s655_s1 = smov 16  }
  0x45   :  { %50 = dma.hbm_to_vmem [thread:$0]  %s792_s2, 512, %s735_s16, [#allocation6], %s654_s0, %s654_s0, %s655_s1  }
  0x46   :  { %s656_s13 = smov [#allocation10]   ;;  %s622_s19 = scalar_lea.hbm %s795_s5, 8192 }
  0x47   :  { %s68_s15 = sshll.u32 %s656_s13, 4  ;;  %p623_p4 = scmp.ne.s32.totalorder %s795_s5, %s622_s19  ;;  %s69_s15 = int_to_ptr.vmem [resolvable:$true] %s68_s15 }
  0x48   :  { %p626_p5 = scmp.lt.u32.totalorder %s622_s19, %s795_s5 }
  0x4a   :  { %p628_p6 = pnand %p626_p5, %p623_p4 }
  0x4c   :  { %631 = shalt.err (!%p628_p6)
}
  0x4d   :  { %s632_s3 = scalar_lea.vmem %s69_s15, 8192  ;;  %p637_p8 = scmp.lt.s32.totalorder %s69_s15, %s69_s15 }
  0x4e   :  { %p633_p7 = scmp.ne.s32.totalorder %s69_s15, %s632_s3  ;;  %p638_p9 = scmp.lt.s32.totalorder %s632_s3, %s632_s3 }
  0x50   :  { %p639_p10 = por %p638_p9, %p637_p8 }
  0x52   :  { %p640_p11 = pnand %p639_p10, %p633_p7 }
  0x54   :  { %643 = shalt.err (!%p640_p11)
}
  0x55   :  { %74 = dma.hbm_to_vmem [thread:$0]  %s795_s5, 8192, %s69_s15, [#allocation9], %s654_s0, %s654_s0, %s655_s1  }
  0x56   :  { %644 = dma.done.wait [#allocation4], 128  }
  0x57   :  { %645 = vsyncadd [#allocation4], 4294967168 }
  0x58   :  { %646 = dma.done.wait [#allocation6], 640  }
  0x59   :  { %647 = vsyncadd [#allocation6], 4294966656 }
  0x5a   :  { %648 = dma.done.wait [#allocation9], 8448  }
  0x5b   :  { %649 = vsyncadd [#allocation9], 4294958848  ;;  %v657_v1 = vmov 0.0   ;;  %v103_v2 = vld [vmem:[#allocation8 + $0x8] sm:$0xff]  ;;  %v102_v3 = vld [vmem:[#allocation8] sm:$0xff]  ;;  %vm104_vm0 = vcmask 64512  }
  0x5c   :  { %172 = vmatprep.mubr.f32.mxu0 %v657_v1  ;;  %v101_v4 = vld [vmem:[#allocation5] sm:$0xff]  ;;  %108 = vmatprep.subr.mxu0 %v103_v2  ;;  %v98_v5 = vld [vmem:[#allocation7 + $0x8] sm:$0xff]  ;;  %v97_v7 = vld [vmem:[#allocation7] sm:$0xff]  ;;  %vm179_vm1 = vcmask 130048   ;;  %vm444_vm2 = vcmask 7168  }
  0x5d   :  { %v100_v6 = vld [vmem:[#allocation7 + $0x18] sm:$0xff]  ;;  %109 = vmatpush1.msra.mxu0 %v102_v3  ;;  %v99_v9 = vld [vmem:[#allocation7 + $0x10] sm:$0xff]  ;;  %v273_v12 = vld [vmem:[#allocation10 + $0x18] sm:$0xff] }
  0x5e   :  { %v456_v8 = vpack.c.bf16 %v100_v6, %v98_v5  ;;  %v271_v10 = vld [vmem:[#allocation10 + $0x8] sm:$0xff]  ;;  %453 = vmatmul.mubr.msk.f32.vlgmr.msra.gmra.mrb[0].mxu0 %vm104_vm0, %v101_v4  ;;  %v458_v11 = vpack.c.bf16 %v99_v9, %v97_v7  ;;  %v270_v13 = vld [vmem:[#allocation10] sm:$0xff]  ;;  %v272_v14 = vld [vmem:[#allocation10 + $0x10] sm:$0xff] }
  0x5f   :  { %247 = vmatprep.mubr.f32.mxu0 %v657_v1  ;;  %v460_v15 = vpack.c.bf16 %v273_v12, %v271_v10  ;;  %v462_v16 = vpack.c.bf16 %v272_v14, %v270_v13  ;;  %v275_v17 = vld [vmem:[#allocation10 + $0x28] sm:$0xff]  ;;  %v277_v18 = vld [vmem:[#allocation10 + $0x38] sm:$0xff]  ;;  %v274_v19 = vld [vmem:[#allocation10 + $0x20] sm:$0xff] }
  0x60   :  { %457 = vmatprep.subr.bf16.mxu0 %v456_v8  ;;  %v464_v20 = vpack.c.bf16 %v277_v18, %v275_v17  ;;  %v276_v21 = vld [vmem:[#allocation10 + $0x30] sm:$0xff]  ;;  %v279_v22 = vld [vmem:[#allocation10 + $0x48] sm:$0xff]  ;;  %v281_v23 = vld [vmem:[#allocation10 + $0x58] sm:$0xff] }
  0x61   :  { %459 = vmatpush1.bf16.msra.mxu0 %v458_v11  ;;  %461 = vmatprep.subr.bf16.mxu1 %v460_v15  ;;  %v466_v24 = vpack.c.bf16 %v276_v21, %v274_v19  ;;  %v96_v25 = vld [vmem:[#allocation3] sm:$0xff]  ;;  %v468_v26 = vpack.c.bf16 %v281_v23, %v279_v22  ;;  %v280_v28 = vld [vmem:[#allocation10 + $0x50] sm:$0xff]  ;;  %v283_v29 = vld [vmem:[#allocation10 + $0x68] sm:$0xff] }
  0x62   :  { %463 = vmatpush1.bf16.msra.mxu1 %v462_v16  ;;  %v278_v27 = vld [vmem:[#allocation10 + $0x40] sm:$0xff]  ;;  %v285_v30 = vld [vmem:[#allocation10 + $0x78] sm:$0xff]  ;;  %v284_v34 = vld [vmem:[#allocation10 + $0x70] sm:$0xff] }
  0x63   :  { %465 = vmatprep.subr.bf16.mxu1 %v464_v20  ;;  %v470_v31 = vpack.c.bf16 %v280_v28, %v278_v27  ;;  %v472_v32 = vpack.c.bf16 %v285_v30, %v283_v29  ;;  %v282_v33 = vld [vmem:[#allocation10 + $0x60] sm:$0xff]  ;;  %v287_v35 = vld [vmem:[#allocation10 + $0x88] sm:$0xff]  ;;  %v289_v36 = vld [vmem:[#allocation10 + $0x98] sm:$0xff] }
  0x64   :  { %v474_v37 = vpack.c.bf16 %v284_v34, %v282_v33  ;;  %v476_v38 = vpack.c.bf16 %v289_v36, %v287_v35  ;;  %v286_v39 = vld [vmem:[#allocation10 + $0x80] sm:$0xff]  ;;  %v288_v40 = vld [vmem:[#allocation10 + $0x90] sm:$0xff]  ;;  %v291_v41 = vld [vmem:[#allocation10 + $0xa8] sm:$0xff] }
  0x65   :  { %v293_v42 = vld [vmem:[#allocation10 + $0xb8] sm:$0xff]  ;;  %v478_v43 = vpack.c.bf16 %v288_v40, %v286_v39  ;;  %v290_v45 = vld [vmem:[#allocation10 + $0xa0] sm:$0xff]  ;;  %v292_v46 = vld [vmem:[#allocation10 + $0xb0] sm:$0xff] }
  0x66   :  { %454 = vmatmul.mubr.msk.f32.vlgmr.msra.gmra.mrb[0].mxu0 %vm179_vm1, %v96_v25  ;;  %467 = vmatpush1.bf16.msra.mxu1 %v466_v24  ;;  %v480_v44 = vpack.c.bf16 %v293_v42, %v291_v41  ;;  %v295_v47 = vld [vmem:[#allocation10 + $0xc8] sm:$0xff]  ;;  %v297_v48 = vld [vmem:[#allocation10 + $0xd8] sm:$0xff]  ;;  %v482_v49 = vpack.c.bf16 %v292_v46, %v290_v45  ;;  %v294_v51 = vld [vmem:[#allocation10 + $0xc0] sm:$0xff] }
  0x67   :  { %469 = vmatprep.subr.bf16.mxu1 %v468_v26  ;;  %v484_v50 = vpack.c.bf16 %v297_v48, %v295_v47  ;;  %v296_v52 = vld [vmem:[#allocation10 + $0xd0] sm:$0xff]  ;;  %v299_v53 = vld [vmem:[#allocation10 + $0xe8] sm:$0xff]  ;;  %v301_v54 = vld [vmem:[#allocation10 + $0xf8] sm:$0xff] }
  0x68   :  { %v486_v55 = vpack.c.bf16 %v296_v52, %v294_v51  ;;  %v488_v56 = vpack.c.bf16 %v301_v54, %v299_v53  ;;  %v298_v57 = vld [vmem:[#allocation10 + $0xe0] sm:$0xff]  ;;  %v300_v58 = vld [vmem:[#allocation10 + $0xf0] sm:$0xff]  ;;  %v303_v59 = vld [vmem:[#allocation10 + $0x108] sm:$0xff] }
  0x69   :  { %v305_v60 = vld [vmem:[#allocation10 + $0x118] sm:$0xff]  ;;  %v490_v61 = vpack.c.bf16 %v300_v58, %v298_v57  ;;  %v302_v63 = vld [vmem:[#allocation10 + $0x100] sm:$0xff]  ;;  %v304_v0 = vld [vmem:[#allocation10 + $0x110] sm:$0xff] }
  0x6a   :  { %471 = vmatpush1.bf16.msra.mxu1 %v470_v31  ;;  %v492_v62 = vpack.c.bf16 %v305_v60, %v303_v59  ;;  %v307_v1 = vld [vmem:[#allocation10 + $0x128] sm:$0xff]  ;;  %v309_v2 = vld [vmem:[#allocation10 + $0x138] sm:$0xff]  ;;  %v494_v3 = vpack.c.bf16 %v304_v0, %v302_v63  ;;  %v306_v5 = vld [vmem:[#allocation10 + $0x120] sm:$0xff] }
  0x6b   :  { %473 = vmatprep.subr.bf16.mxu1 %v472_v32  ;;  %v496_v4 = vpack.c.bf16 %v309_v2, %v307_v1  ;;  %v308_v6 = vld [vmem:[#allocation10 + $0x130] sm:$0xff]  ;;  %v311_v7 = vld [vmem:[#allocation10 + $0x148] sm:$0xff]  ;;  %v313_v8 = vld [vmem:[#allocation10 + $0x158] sm:$0xff] }
  0x6c   :  { %v498_v9 = vpack.c.bf16 %v308_v6, %v306_v5  ;;  %v500_v10 = vpack.c.bf16 %v313_v8, %v311_v7  ;;  %v310_v11 = vld [vmem:[#allocation10 + $0x140] sm:$0xff]  ;;  %v312_v12 = vld [vmem:[#allocation10 + $0x150] sm:$0xff]  ;;  %v315_v13 = vld [vmem:[#allocation10 + $0x168] sm:$0xff] }
  0x6d   :  { %v317_v14 = vld [vmem:[#allocation10 + $0x178] sm:$0xff]  ;;  %v502_v15 = vpack.c.bf16 %v312_v12, %v310_v11  ;;  %v314_v17 = vld [vmem:[#allocation10 + $0x160] sm:$0xff]  ;;  %v316_v18 = vld [vmem:[#allocation10 + $0x170] sm:$0xff] }
  0x6e   :  { %475 = vmatpush1.bf16.msra.mxu1 %v474_v37  ;;  %v504_v16 = vpack.c.bf16 %v317_v14, %v315_v13  ;;  %v319_v19 = vld [vmem:[#allocation10 + $0x188] sm:$0xff]  ;;  %v321_v20 = vld [vmem:[#allocation10 + $0x198] sm:$0xff]  ;;  %v506_v21 = vpack.c.bf16 %v316_v18, %v314_v17  ;;  %v318_v23 = vld [vmem:[#allocation10 + $0x180] sm:$0xff] }
  0x6f   :  { %477 = vmatprep.subr.bf16.mxu1 %v476_v38  ;;  %v508_v22 = vpack.c.bf16 %v321_v20, %v319_v19  ;;  %v320_v24 = vld [vmem:[#allocation10 + $0x190] sm:$0xff]  ;;  %v323_v25 = vld [vmem:[#allocation10 + $0x1a8] sm:$0xff]  ;;  %v325_v26 = vld [vmem:[#allocation10 + $0x1b8] sm:$0xff] }
  0x70   :  { %v510_v27 = vpack.c.bf16 %v320_v24, %v318_v23  ;;  %v512_v28 = vpack.c.bf16 %v325_v26, %v323_v25  ;;  %v322_v29 = vld [vmem:[#allocation10 + $0x1a0] sm:$0xff]  ;;  %v324_v30 = vld [vmem:[#allocation10 + $0x1b0] sm:$0xff]  ;;  %v327_v31 = vld [vmem:[#allocation10 + $0x1c8] sm:$0xff] }
  0x71   :  { %v329_v32 = vld [vmem:[#allocation10 + $0x1d8] sm:$0xff]  ;;  %v514_v33 = vpack.c.bf16 %v324_v30, %v322_v29  ;;  %v326_v35 = vld [vmem:[#allocation10 + $0x1c0] sm:$0xff]  ;;  %v328_v36 = vld [vmem:[#allocation10 + $0x1d0] sm:$0xff] }
  0x72   :  { %479 = vmatpush1.bf16.msra.mxu1 %v478_v43  ;;  %v516_v34 = vpack.c.bf16 %v329_v32, %v327_v31  ;;  %v518_v37 = vpack.c.bf16 %v328_v36, %v326_v35  ;;  %v331_v38 = vld [vmem:[#allocation10 + $0x1e8] sm:$0xff]  ;;  %v333_v39 = vld [vmem:[#allocation10 + $0x1f8] sm:$0xff]  ;;  %v330_v41 = vld [vmem:[#allocation10 + $0x1e0] sm:$0xff] }
  0x73   :  { %481 = vmatprep.subr.bf16.mxu1 %v480_v44  ;;  %v520_v40 = vpack.c.bf16 %v333_v39, %v331_v38  ;;  %v332_v42 = vld [vmem:[#allocation10 + $0x1f0] sm:$0xff]  ;;  %v256_v44 = vlaneseq  ;;  %v254_v47 = vld [vmem:[%s794_s4] sm:$0x3] }
  0x74   :  { %v522_v43 = vpack.c.bf16 %v332_v42, %v330_v41  ;;  %v334_v57 = vld [vmem:[%s796_s6] sm:$0x3] }
  0x75   :  { %v257_v45 = vshrl.u32 %v256_v44, 7  ;;  %v419_v60 = vld [vmem:[%s797_s7] sm:$0x3] }
  0x76   :  { %483 = vmatpush1.bf16.msra.mxu1 %v482_v49  ;;  %v455_v8 = vld [vmem:[#allocation2] ss:$0 sm:$0xff] }
  0x77   :  { %485 = vmatprep.subr.bf16.mxu1 %v484_v50  ;;  %v258_v46 = vsub.s32 0, %v257_v45  ;;  %v262_v48 = vsub.s32 1, %v257_v45 }
  0x79   :  { %v259_v49 = vrot.slane %v254_v47, %v258_v46  ;;  %v263_v50 = vrot.slane %v254_v47, %v262_v48  ;;  %v339_v58 = vrot.slane %v334_v57, %v258_v46  ;;  %v343_v59 = vrot.slane %v334_v57, %v262_v48 }
  0x7a   :  { %487 = vmatpush1.bf16.msra.mxu1 %v486_v55  ;;  %v424_v0 = vrot.slane %v419_v60, %v258_v46  ;;  %v428_v2 = vrot.slane %v419_v60, %v262_v48 }
  0x7b   :  { %489 = vmatprep.subr.bf16.mxu1 %v488_v56 }
  0x7e   :  { %491 = vmatpush1.bf16.msra.mxu1 %v490_v61 }
  0x7f   :  { %493 = vmatprep.subr.bf16.mxu1 %v492_v62 }
  0x82   :  { %495 = vmatpush1.bf16.msra.mxu1 %v494_v3 }
  0x83   :  { %497 = vmatprep.subr.bf16.mxu1 %v496_v4 }
  0x86   :  { %499 = vmatpush1.bf16.msra.mxu1 %v498_v9 }
  0x87   :  { %501 = vmatprep.subr.bf16.mxu1 %v500_v10 }
  0x8a   :  { %503 = vmatpush1.bf16.msra.mxu1 %v502_v15 }
  0x8b   :  { %505 = vmatprep.subr.bf16.mxu1 %v504_v16 }
  0x8e   :  { %507 = vmatpush1.bf16.msra.mxu1 %v506_v21 }
  0x8f   :  { %509 = vmatprep.subr.bf16.mxu1 %v508_v22 }
  0x92   :  { %511 = vmatpush1.bf16.msra.mxu1 %v510_v27 }
  0x93   :  { %513 = vmatprep.subr.bf16.mxu1 %v512_v28 }
  0x96   :  { %515 = vmatpush1.bf16.msra.mxu1 %v514_v33 }
  0x97   :  { %517 = vmatprep.subr.bf16.mxu1 %v516_v34 }
  0x9a   :  { %519 = vmatpush1.bf16.msra.mxu1 %v518_v37 }
  0x9b   :  { %521 = vmatprep.subr.bf16.mxu1 %v520_v40 }
  0x9e   :  { %523 = vmatpush1.bf16.msra.mxu1 %v522_v43 }
 0x139   :  { %v249_v51 = vpop.f32.mrb[0].mxu0 }
 0x13a   :  { %v266_v52 = vadd.f32 %v259_v49, %v249_v51  ;;  %v251_v53 = vpop.f32.mrb[1].mxu0 }
 0x13b   :  { %v267_v54 = vadd.f32 %v263_v50, %v251_v53 }
 0x13c   :  { %v268_v56 = vmax.f32 %v266_v52, 0.0 }
 0x13d   :  { %v269_v55 = vmax.f32 %v267_v54, 0.0 }
 0x13f   :  { %410 = vmatprep.mubr.f32.mxu1 %v269_v55 }
 0x140   :  { %411 = vmatmul.mubr.f32.vlgmr.msra.gmra.mrb[0].mxu1 %v268_v56 }
 0x213   :  { %v412_v61 = vpop.f32.mrb[0].mxu1 }
 0x214   :  { %v413_v62 = vadd.f32 %v412_v61, %v339_v58  ;;  %v414_v63 = vpop.f32.mrb[1].mxu1 }
 0x215   :  { %v415_v1 = vadd.f32 %v414_v63, %v343_v59 }
 0x216   :  { %v417_v3 = vmax.f32 %v413_v62, 0.0 }
 0x217   :  { %v418_v4 = vmax.f32 %v415_v1, 0.0 }
 0x218   :  { %v431_v5 = vmul.f32 %v424_v0, %v417_v3 }
 0x219   :  { %v432_v6 = vmul.f32 %v428_v2, %v418_v4 }
 0x21b   :  { %v433_v7 = vadd.f32 %v432_v6, %v431_v5 }
 0x21d   :  { %434 = vadd.xlane.f32.xlu0 %v433_v7 }
 0x2aa   :  { %v435_v9 = vpop.xlane.xlu0 %434 }
 0x2ab   :  { %v443_v10 = vadd.f32 %v455_v8, %v435_v9 }
 0x2ad   :  { %445 = vst.msk [vmem:[%s799_s9] sm:$0xff] %vm444_vm2, %v443_v10 }
 0x2ae   :  { %450 = vsyncpa [#allocation4], 1 }
 0x2af   :  { %451 = vsyncpa [#allocation6], 1 }
 0x2b0   :  { %452 = vsyncpa [#allocation9], 1 }

</bundles_post_ra>
